<compile_context>
chip_gen: v6e
topology: v6e:2x2x1
jax: 0.10.0
libtpu: 0.0.40
codegen_flags: <defaults>
</compile_context>

<pallas_src>
import math
import functools

import jax
import jax.numpy as jnp
from jax.experimental import pallas as pl
from jax.experimental.pallas import tpu as pltpu

HIDDEN = 32          # config.hidden_size (small synthetic value)
VOCAB = 768          # decoder output size (fixed in the module)
LN_EPS = 1e-12       # config.layer_norm_eps (BERT default)
TILE_N = 1024        # rows per grid step (~6.3 MiB double-buffered footprint)


def _gelu(x):
    # exact erf-based gelu, matching the PyTorch reference
    return x * 0.5 * (1.0 + jax.lax.erf(x / math.sqrt(2.0)))


def _round_up(n, m):
    return ((n + m - 1) // m) * m


def lm_head_kernel(x_ref, w1_ref, b1_ref, gamma_ref, beta_ref, w2_ref, b2_ref, o_ref):
    # ---- transform.dense: x @ W1 + b1  (MXU, f32 accumulation) ----
    h = jnp.dot(x_ref[...], w1_ref[...],
                preferred_element_type=jnp.float32) + b1_ref[...]

    # ---- transform.transform_act_fn: exact (erf) gelu ----
    h = _gelu(h)

    # ---- transform.LayerNorm over the hidden dim (all math in f32) ----
    mean = jnp.mean(h, axis=-1, keepdims=True)
    var = jnp.mean(jnp.square(h - mean), axis=-1, keepdims=True)
    h = (h - mean) * jax.lax.rsqrt(var + LN_EPS)
    h = h * gamma_ref[...] + beta_ref[...]

    # ---- decoder: h @ W2 + bias ----
    out = jnp.dot(h, w2_ref[...],
                  preferred_element_type=jnp.float32) + b2_ref[...]
    o_ref[...] = out.astype(o_ref.dtype)


@functools.partial(jax.jit, static_argnames=("tile_n", "out_dtype"))
def visual_lm_prediction_head(x, params, *, tile_n=TILE_N, out_dtype=None):
    """x: [B, S, H] -> [B, S, 768].  out_dtype defaults to x.dtype."""
    B, S, H = x.shape
    assert H == HIDDEN
    N = B * S
    out_dtype = x.dtype if out_dtype is None else out_dtype

    x2d = x.reshape(N, H)

    # Effective tile: at most `tile_n`, 8-row (sublane) aligned; pad rows so
    # the grid divides exactly.  Padded zero rows are numerically benign
    # (var=0 -> rsqrt(eps) finite) and are sliced off below.
    tn = min(tile_n, _round_up(N, 8))
    n_pad = _round_up(N, tn)
    if n_pad != N:
        x2d = jnp.pad(x2d, ((0, n_pad - N), (0, 0)))
    grid = (n_pad // tn,)

    w1 = params["w1"]        # [H, H]   (pre-transposed: y = x @ w1)
    b1 = params["b1"]        # [1, H]
    gamma = params["gamma"]  # [1, H]
    beta = params["beta"]    # [1, H]
    w2 = params["w2"]        # [H, 768]
    b2 = params["b2"]        # [1, 768]

    const = lambda shape: pl.BlockSpec(shape, lambda i: tuple(0 for _ in shape))
    in_size = jnp.dtype(x.dtype).itemsize
    out_size = jnp.dtype(out_dtype).itemsize

    cost = pl.CostEstimate(
        flops=2 * n_pad * H * (H + VOCAB) + 10 * n_pad * H,
        transcendentals=n_pad * (H + 1),          # erf per element + rsqrt per row
        bytes_accessed=(n_pad * H * in_size
                        + n_pad * VOCAB * out_size
                        + (H * H + H * VOCAB + 3 * H + VOCAB) * 4),
    )

    out2d = pl.pallas_call(
        lm_head_kernel,
        out_shape=jax.ShapeDtypeStruct((n_pad, VOCAB), out_dtype),
        grid_spec=pltpu.PrefetchScalarGridSpec(
            num_scalar_prefetch=0,
            grid=grid,
            in_specs=[
                pl.BlockSpec((tn, H), lambda i: (i, 0)),   # x: row-tiled
                const((H, H)),                             # w1 (VMEM-resident)
                const((1, H)),                             # b1
                const((1, H)),                             # gamma
                const((1, H)),                             # beta
                const((H, VOCAB)),                         # w2
                const((1, VOCAB)),                         # b2
            ],
            out_specs=pl.BlockSpec((tn, VOCAB), lambda i: (i, 0)),
        ),
        compiler_params=pltpu.CompilerParams(
            dimension_semantics=("parallel",),     # independent row tiles
            vmem_limit_bytes=64 << 20,             # headroom for double buffers
        ),
        cost_estimate=cost,
    )(x2d, w1, b1, gamma, beta, w2, b2)

    if n_pad != N:
        out2d = out2d[:N]
    return out2d.reshape(B, S, VOCAB)


def init_params(key, hidden=HIDDEN, vocab=VOCAB, dtype=jnp.float32):
    k1, k2 = jax.random.split(key, 2)
    # nn.Linear-style small random weights (deterministic); LayerNorm gamma=1,
    # beta=0; decoder bias zeros (nn.Parameter(torch.zeros(768))).
    bound1 = 1.0 / math.sqrt(hidden)
    w1 = jax.random.uniform(k1, (hidden, hidden), dtype, -bound1, bound1)
    b1 = jnp.zeros((1, hidden), dtype)
    gamma = jnp.ones((1, hidden), dtype)
    beta = jnp.zeros((1, hidden), dtype)
    w2 = jax.random.uniform(k2, (hidden, vocab), dtype, -bound1, bound1)
    b2 = jnp.zeros((1, vocab), dtype)
    return dict(w1=w1, b1=b1, gamma=gamma, beta=beta, w2=w2, b2=b2)


def _reference(x, p):
    # pure-JAX reference (same math as the PyTorch module)
    h = x @ p["w1"] + p["b1"][0]
    h = _gelu(h)
    mean = jnp.mean(h, axis=-1, keepdims=True)
    var = jnp.mean(jnp.square(h - mean), axis=-1, keepdims=True)
    h = (h - mean) * jax.lax.rsqrt(var + LN_EPS)
    h = h * p["gamma"][0] + p["beta"][0]
    return h @ p["w2"] + p["b2"][0]


if __name__ == "__main__":
    key = jax.random.PRNGKey(0)
    kx, kx2, kp = jax.random.split(key, 3)
    params = init_params(kp)

    # Primary small test: B=2, S=8, H=32 (N = 16, single grid step).
    B, S = 2, 8
    x = jax.random.normal(kx, (B, S, HIDDEN), jnp.float32)
    out = jax.block_until_ready(visual_lm_prediction_head(x, params))
    ref = _reference(x.reshape(-1, HIDDEN), params).reshape(B, S, VOCAB)
    assert out.shape == (B, S, VOCAB)
    assert jnp.allclose(out, ref, atol=1e-4, rtol=1e-4), "mismatch vs reference"

    # Second test: N not a multiple of 8 -> exercises the row-padding path.
    B2, S2 = 3, 7
    x2 = jax.random.normal(kx2, (B2, S2, HIDDEN), jnp.float32)
    out2 = jax.block_until_ready(visual_lm_prediction_head(x2, params))
    ref2 = _reference(x2.reshape(-1, HIDDEN), params).reshape(B2, S2, VOCAB)
    assert out2.shape == (B2, S2, VOCAB)
    assert jnp.allclose(out2, ref2, atol=1e-4, rtol=1e-4), "mismatch (padded path)"

    print("KERNEL_OK")
</pallas_src>

<mosaic_0001>
module attributes {stable_mosaic.version = 11 : i64} {
  func.func @lm_head_kernel(%arg0: i32, %arg1: memref<16x32xf32, #tpu.memory_space<vmem>>, %arg2: memref<32x32xf32, #tpu.memory_space<vmem>>, %arg3: memref<1x32xf32, #tpu.memory_space<vmem>>, %arg4: memref<1x32xf32, #tpu.memory_space<vmem>>, %arg5: memref<1x32xf32, #tpu.memory_space<vmem>>, %arg6: memref<32x768xf32, #tpu.memory_space<vmem>>, %arg7: memref<1x768xf32, #tpu.memory_space<vmem>>, %arg8: memref<16x768xf32, #tpu.memory_space<vmem>>) attributes {dimension_semantics = [#tpu.dimension_semantics<parallel>], iteration_bounds = array<i64: 1>, scalar_prefetch = 0 : i64, scratch_operands = 0 : i64, tpu.core_type = #tpu.core_type<tc>, window_params = [{transform_indices = @transform_0, window_bounds = array<i64: 16, 32>}, {pipeline_mode = #tpu.pipeline_mode<synchronous>, transform_indices = @transform_1, window_bounds = array<i64: 32, 32>}, {pipeline_mode = #tpu.pipeline_mode<synchronous>, transform_indices = @transform_2, window_bounds = array<i64: 1, 32>}, {pipeline_mode = #tpu.pipeline_mode<synchronous>, transform_indices = @transform_3, window_bounds = array<i64: 1, 32>}, {pipeline_mode = #tpu.pipeline_mode<synchronous>, transform_indices = @transform_4, window_bounds = array<i64: 1, 32>}, {pipeline_mode = #tpu.pipeline_mode<synchronous>, transform_indices = @transform_5, window_bounds = array<i64: 32, 768>}, {pipeline_mode = #tpu.pipeline_mode<synchronous>, transform_indices = @transform_6, window_bounds = array<i64: 1, 768>}, {transform_indices = @transform_7, window_bounds = array<i64: 16, 768>}]} {
    %c0 = arith.constant 0 : index
    %c0_0 = arith.constant 0 : index
    %0 = vector.load %arg1[%c0, %c0_0] : memref<16x32xf32, #tpu.memory_space<vmem>>, vector<16x32xf32>
    %c0_1 = arith.constant 0 : index
    %c0_2 = arith.constant 0 : index
    %1 = vector.load %arg2[%c0_1, %c0_2] : memref<32x32xf32, #tpu.memory_space<vmem>>, vector<32x32xf32>
    %cst = arith.constant dense<0.000000e+00> : vector<16x32xf32>
    %2 = tpu.matmul %0, %1, %cst {dimension_numbers = #tpu.dot_dimension_numbers<[1], [0], [0], [1], [0, 0, 1, 1], [], []>} : vector<16x32xf32>, vector<32x32xf32>, vector<16x32xf32> -> vector<16x32xf32>
    %c0_3 = arith.constant 0 : index
    %c0_4 = arith.constant 0 : index
    %3 = vector.load %arg3[%c0_3, %c0_4] : memref<1x32xf32, #tpu.memory_space<vmem>>, vector<1x32xf32>
    %4 = vector.broadcast %3 : vector<1x32xf32> to vector<16x32xf32>
    %5 = arith.addf %2, %4 : vector<16x32xf32>
    %cst_5 = arith.constant 5.000000e-01 : f32
    %6 = vector.broadcast %cst_5 : f32 to vector<16x32xf32>
    %7 = arith.mulf %5, %6 : vector<16x32xf32>
    %cst_6 = arith.constant 1.41421354 : f32
    %8 = vector.broadcast %cst_6 : f32 to vector<16x32xf32>
    %9 = arith.divf %5, %8 : vector<16x32xf32>
    %10 = math.erf %9 : vector<16x32xf32>
    %cst_7 = arith.constant 1.000000e+00 : f32
    %11 = vector.broadcast %cst_7 : f32 to vector<16x32xf32>
    %12 = arith.addf %11, %10 : vector<16x32xf32>
    %13 = arith.mulf %7, %12 : vector<16x32xf32>
    %cst_8 = arith.constant dense<0.000000e+00> : vector<16xf32>
    %14 = vector.multi_reduction <add>, %13, %cst_8 [1] : vector<16x32xf32> to vector<16xf32>
    %15 = vector.shape_cast %14 : vector<16xf32> to vector<16x1xf32>
    %cst_9 = arith.constant 3.200000e+01 : f32
    %16 = vector.broadcast %cst_9 : f32 to vector<16x1xf32>
    %17 = arith.divf %15, %16 : vector<16x1xf32>
    %18 = vector.broadcast %17 : vector<16x1xf32> to vector<16x32xf32>
    %19 = arith.subf %13, %18 : vector<16x32xf32>
    %20 = arith.mulf %19, %19 : vector<16x32xf32>
    %cst_10 = arith.constant dense<0.000000e+00> : vector<16xf32>
    %21 = vector.multi_reduction <add>, %20, %cst_10 [1] : vector<16x32xf32> to vector<16xf32>
    %22 = vector.shape_cast %21 : vector<16xf32> to vector<16x1xf32>
    %cst_11 = arith.constant 3.200000e+01 : f32
    %23 = vector.broadcast %cst_11 : f32 to vector<16x1xf32>
    %24 = arith.divf %22, %23 : vector<16x1xf32>
    %25 = vector.broadcast %17 : vector<16x1xf32> to vector<16x32xf32>
    %26 = arith.subf %13, %25 : vector<16x32xf32>
    %cst_12 = arith.constant 9.99999996E-13 : f32
    %27 = vector.broadcast %cst_12 : f32 to vector<16x1xf32>
    %28 = arith.addf %24, %27 : vector<16x1xf32>
    %29 = math.rsqrt %28 : vector<16x1xf32>
    %30 = vector.broadcast %29 : vector<16x1xf32> to vector<16x32xf32>
    %31 = arith.mulf %26, %30 : vector<16x32xf32>
    %c0_13 = arith.constant 0 : index
    %c0_14 = arith.constant 0 : index
    %32 = vector.load %arg4[%c0_13, %c0_14] : memref<1x32xf32, #tpu.memory_space<vmem>>, vector<1x32xf32>
    %33 = vector.broadcast %32 : vector<1x32xf32> to vector<16x32xf32>
    %34 = arith.mulf %31, %33 : vector<16x32xf32>
    %c0_15 = arith.constant 0 : index
    %c0_16 = arith.constant 0 : index
    %35 = vector.load %arg5[%c0_15, %c0_16] : memref<1x32xf32, #tpu.memory_space<vmem>>, vector<1x32xf32>
    %36 = vector.broadcast %35 : vector<1x32xf32> to vector<16x32xf32>
    %37 = arith.addf %34, %36 : vector<16x32xf32>
    %c0_17 = arith.constant 0 : index
    %c0_18 = arith.constant 0 : index
    %38 = vector.load %arg6[%c0_17, %c0_18] : memref<32x768xf32, #tpu.memory_space<vmem>>, vector<32x768xf32>
    %cst_19 = arith.constant dense<0.000000e+00> : vector<16x768xf32>
    %39 = tpu.matmul %37, %38, %cst_19 {dimension_numbers = #tpu.dot_dimension_numbers<[1], [0], [0], [1], [0, 0, 1, 1], [], []>} : vector<16x32xf32>, vector<32x768xf32>, vector<16x768xf32> -> vector<16x768xf32>
    %c0_20 = arith.constant 0 : index
    %c0_21 = arith.constant 0 : index
    %40 = vector.load %arg7[%c0_20, %c0_21] : memref<1x768xf32, #tpu.memory_space<vmem>>, vector<1x768xf32>
    %41 = vector.broadcast %40 : vector<1x768xf32> to vector<16x768xf32>
    %42 = arith.addf %39, %41 : vector<16x768xf32>
    %c0_22 = arith.constant 0 : index
    %c0_23 = arith.constant 0 : index
    %43 = vector.load %arg8[%c0_22, %c0_23] : memref<16x768xf32, #tpu.memory_space<vmem>>, vector<16x768xf32>
    tpu.vector_store %arg8[%c0_22, %c0_23], %42 {strides = array<i32>} : memref<16x768xf32, #tpu.memory_space<vmem>>, vector<16x768xf32>,
    return
  }
  func.func @transform_0(%arg0: i32) -> (i32, i32) {
    %c0_i32 = arith.constant 0 : i32
    %c0_i32_0 = arith.constant 0 : i32
    return %arg0, %c0_i32 : i32, i32
  }
  func.func @transform_1(%arg0: i32) -> (i32, i32) {
    %c0_i32 = arith.constant 0 : i32
    %c0_i32_0 = arith.constant 0 : i32
    %c0_i32_1 = arith.constant 0 : i32
    return %c0_i32, %c0_i32_0 : i32, i32
  }
  func.func @transform_2(%arg0: i32) -> (i32, i32) {
    %c0_i32 = arith.constant 0 : i32
    %c0_i32_0 = arith.constant 0 : i32
    %c0_i32_1 = arith.constant 0 : i32
    return %c0_i32, %c0_i32_0 : i32, i32
  }
  func.func @transform_3(%arg0: i32) -> (i32, i32) {
    %c0_i32 = arith.constant 0 : i32
    %c0_i32_0 = arith.constant 0 : i32
    %c0_i32_1 = arith.constant 0 : i32
    return %c0_i32, %c0_i32_0 : i32, i32
  }
  func.func @transform_4(%arg0: i32) -> (i32, i32) {
    %c0_i32 = arith.constant 0 : i32
    %c0_i32_0 = arith.constant 0 : i32
    %c0_i32_1 = arith.constant 0 : i32
    return %c0_i32, %c0_i32_0 : i32, i32
  }
  func.func @transform_5(%arg0: i32) -> (i32, i32) {
    %c0_i32 = arith.constant 0 : i32
    %c0_i32_0 = arith.constant 0 : i32
    %c0_i32_1 = arith.constant 0 : i32
    return %c0_i32, %c0_i32_0 : i32, i32
  }
  func.func @transform_6(%arg0: i32) -> (i32, i32) {
    %c0_i32 = arith.constant 0 : i32
    %c0_i32_0 = arith.constant 0 : i32
    %c0_i32_1 = arith.constant 0 : i32
    return %c0_i32, %c0_i32_0 : i32, i32
  }
  func.func @transform_7(%arg0: i32) -> (i32, i32) {
    %c0_i32 = arith.constant 0 : i32
    %c0_i32_0 = arith.constant 0 : i32
    return %arg0, %c0_i32 : i32, i32
  }
}

</mosaic_0001>

<bundles_post_ra>
// kernel: visual_lm_prediction_head.1
= control target key start
LH: loop header
LB: loop body
LE: loop exit
PB: predicated region body
PF: predicated region fallthrough
CT: control target
= control target key end

     0   :  { %12 = vsyncpa [#allocation3], 0  ;;  %s801_s0 = inlined_call_operand.hbm [shape: f32[16,32], index: 0, kind: input, shape index: {}]   ;;  %s802_s1 = inlined_call_operand.hbm [shape: f32[32,32], index: 1, kind: input, shape index: {}]   ;;  %s803_s2 = inlined_call_operand.vmem [shape: f32[1,32], index: 2, kind: input, shape index: {}]   ;;  %s804_s3 = inlined_call_operand.vmem [shape: f32[1,32], index: 3, kind: input, shape index: {}]   ;;  %s805_s4 = inlined_call_operand.vmem [shape: f32[1,32], index: 4, kind: input, shape index: {}]   ;;  %s806_s5 = inlined_call_operand.hbm [shape: f32[32,768], index: 5, kind: input, shape index: {}]   ;;  %s807_s6 = inlined_call_operand.hbm [shape: f32[1,768], index: 6, kind: input, shape index: {}]   ;;  %s808_s7 = inlined_call_operand.hbm [shape: f32[16,768], index: 7, kind: output, shape index: {}]  }
   0x1   :  { %13 = vsyncpa [#allocation6], 0 }
   0x2   :  { %14 = vsyncpa [#allocation9], 0 }
   0x3   :  { %15 = vsyncpa [#allocation4], 0  ;;  %s709_s24 = smov [#allocation5]   ;;  %s710_s26 = smov [#allocation2]  }
   0x4   :  { %s33_s25 = sshll.u32 %s709_s24, 4  ;;  %s21_s27 = sshll.u32 %s710_s26, 4  ;;  %s34_s25 = int_to_ptr.vmem [resolvable:$true] %s33_s25  ;;  %s22_s27 = int_to_ptr.vmem [resolvable:$true] %s21_s27 }
   0x5   :  { %s609_s28 = scalar_lea.vmem %s34_s25, 512  ;;  %p614_p1 = scmp.lt.s32.totalorder %s34_s25, %s34_s25 }
   0x6   :  { %p610_p0 = scmp.ne.s32.totalorder %s34_s25, %s609_s28  ;;  %p615_p2 = scmp.lt.s32.totalorder %s609_s28, %s609_s28 }
   0x8   :  { %p616_p3 = por %p615_p2, %p614_p1 }
   0xa   :  { %p617_p4 = pnand %p616_p3, %p610_p0 }
   0xc   :  { %620 = shalt.err (!%p617_p4)
}
   0xd   :  { %s711_s29 = smov 128   ;;  %s712_s30 = smov 8  }
   0xe   :  { %39 = dma.hbm_to_vmem [thread:$0]  %s802_s1, 512, %s34_s25, [#allocation6], %s711_s29, %s711_s29, %s712_s30  }
   0xf   :  { %s629_s10 = scalar_lea.vmem %s22_s27, 256  ;;  %p634_p6 = scmp.lt.s32.totalorder %s22_s27, %s22_s27 }
  0x10   :  { %p630_p5 = scmp.ne.s32.totalorder %s22_s27, %s629_s10  ;;  %p635_p7 = scmp.lt.s32.totalorder %s629_s10, %s629_s10 }
  0x12   :  { %p636_p8 = por %p635_p7, %p634_p6 }
  0x14   :  { %p637_p9 = pnand %p636_p8, %p630_p5 }
  0x16   :  { %640 = shalt.err (!%p637_p9)
}
  0x17   :  { %27 = dma.hbm_to_vmem [thread:$0]  %s801_s0, 256, %s22_s27, [#allocation3], %s711_s29, %s711_s29, %s712_s30  }
  0x18   :  { %s713_s13 = smov [#allocation7]  }
  0x19   :  { %s51_s14 = sshll.u32 %s713_s13, 4  ;;  %s52_s14 = int_to_ptr.vmem [resolvable:$true] %s51_s14 }
  0x1a   :  { %s649_s15 = scalar_lea.vmem %s52_s14, 3072  ;;  %p654_p11 = scmp.lt.s32.totalorder %s52_s14, %s52_s14 }
  0x1b   :  { %p650_p10 = scmp.ne.s32.totalorder %s52_s14, %s649_s15  ;;  %p655_p12 = scmp.lt.s32.totalorder %s649_s15, %s649_s15 }
  0x1d   :  { %p656_p13 = por %p655_p12, %p654_p11 }
  0x1f   :  { %p657_p0 = pnand %p656_p13, %p650_p10 }
  0x21   :  { %660 = shalt.err (!%p657_p0)
}
  0x22   :  { %s714_s1 = smov 768   ;;  %s715_s16 = smov 48  }
  0x23   :  { %57 = dma.hbm_to_vmem [thread:$0]  %s806_s5, 3072, %s52_s14, [#allocation6], %s714_s1, %s714_s1, %s715_s16  }
  0x24   :  { %s716_s0 = smov [#allocation8]  }
  0x25   :  { %s64_s19 = sshll.u32 %s716_s0, 4  ;;  %s65_s19 = int_to_ptr.vmem [resolvable:$true] %s64_s19 }
  0x26   :  { %s669_s20 = scalar_lea.vmem %s65_s19, 96  ;;  %p674_p2 = scmp.lt.s32.totalorder %s65_s19, %s65_s19 }
  0x27   :  { %p670_p1 = scmp.ne.s32.totalorder %s65_s19, %s669_s20  ;;  %p675_p3 = scmp.lt.s32.totalorder %s669_s20, %s669_s20 }
  0x29   :  { %p676_p4 = por %p675_p3, %p674_p2 }
  0x2b   :  { %p677_p5 = pnand %p676_p4, %p670_p1 }
  0x2d   :  { %680 = shalt.err (!%p677_p5)
}
  0x2e   :  { %67 = dma.hbm_to_vmem [thread:$0]  %s807_s6, 96, %s65_s19, [#allocation9]  }
  0x2f   :  { %701 = dma.done.wait [#allocation3], 256  }
  0x30   :  { %702 = vsyncadd [#allocation3], 4294967040 }
  0x31   :  { %703 = dma.done.wait [#allocation6], 3584  }
  0x32   :  { %704 = vsyncadd [#allocation6], 4294963712 }
  0x33   :  { %705 = dma.done.wait [#allocation9], 96  }
  0x34   :  { %706 = vsyncadd [#allocation9], 4294967200  ;;  %vm93_vm0 = vcmask 261120   ;;  %v85_v0 = vld [vmem:[#allocation5 + $0x18] sm:$0xff]  ;;  %v84_v1 = vld [vmem:[#allocation5 + $0x10] sm:$0xff]  ;;  %v717_v50 = vmov 0.0  }
  0x35   :  { %572 = vmatprep.subr.mxu0 %v85_v0  ;;  %v80_v2 = vld [vmem:[#allocation2] sm:$0xff]  ;;  %v83_v3 = vld [vmem:[#allocation5 + $0x8] sm:$0xff]  ;;  %v82_v4 = vld [vmem:[#allocation5] sm:$0xff]  ;;  %357 = vmatprep.mubr.f32.mxu1 %v717_v50 }
  0x36   :  { %573 = vmatpush3.msra.mxu0 %v85_v0  ;;  %580 = vmatprep.mubr.msk.f32.mxu0 %vm93_vm0, %v80_v2  ;;  %v81_v5 = vld [vmem:[#allocation2 + $0x8] sm:$0xff]  ;;  %v555_v6 = vld [vmem:[%s803_s2] ss:$0 sm:$0xff]  ;;  %v252_v35 = vld [vmem:[#allocation7 + $0xa8] sm:$0xff] }
  0x37   :  { %574 = vmatprep.subr.mxu0 %v84_v1  ;;  %v250_v33 = vld [vmem:[#allocation7 + $0x98] sm:$0xff]  ;;  %v249_v34 = vld [vmem:[#allocation7 + $0x90] sm:$0xff]  ;;  %v244_v36 = vld [vmem:[#allocation7 + $0x68] sm:$0xff] }
  0x38   :  { %575 = vmatpush3.msra.mxu0 %v84_v1  ;;  %317 = vmatprep.subr.mxu1 %v250_v33  ;;  %v251_v37 = vld [vmem:[#allocation7 + $0xa0] sm:$0xff]  ;;  %v246_v39 = vld [vmem:[#allocation7 + $0x78] sm:$0xff]  ;;  %v245_v41 = vld [vmem:[#allocation7 + $0x70] sm:$0xff] }
  0x39   :  { %576 = vmatprep.subr.mxu0 %v83_v3  ;;  %v243_v38 = vld [vmem:[#allocation7 + $0x60] sm:$0xff]  ;;  %318 = vmatpush1.msra.mxu1 %v249_v34  ;;  %v238_v40 = vld [vmem:[#allocation7 + $0x38] sm:$0xff]  ;;  %v237_v42 = vld [vmem:[#allocation7 + $0x30] sm:$0xff] }
  0x3a   :  { %577 = vmatpush3.msra.mxu0 %v83_v3  ;;  %319 = vmatprep.subr.mxu1 %v244_v36  ;;  %v240_v43 = vld [vmem:[#allocation7 + $0x48] sm:$0xff]  ;;  %v239_v45 = vld [vmem:[#allocation7 + $0x40] sm:$0xff]  ;;  %v234_v46 = vld [vmem:[#allocation7 + $0x18] sm:$0xff] }
  0x3b   :  { %578 = vmatprep.subr.mxu0 %v82_v4  ;;  %320 = vmatpush1.msra.mxu1 %v243_v38  ;;  %v232_v44 = vld [vmem:[#allocation7 + $0x8] sm:$0xff]  ;;  %v231_v47 = vld [vmem:[#allocation7] sm:$0xff]  ;;  %v233_v48 = vld [vmem:[#allocation7 + $0x10] sm:$0xff] }
  0x3c   :  { %579 = vmatpush3.msra.mxu0 %v82_v4  ;;  %321 = vmatprep.subr.mxu1 %v238_v40  ;;  %v254_v49 = vld [vmem:[#allocation7 + $0xb8] sm:$0xff]  ;;  %v558_v58 = vld [vmem:[%s804_s3] ss:$0 sm:$0xff]  ;;  %v248_v2 = vld [vmem:[#allocation7 + $0x88] sm:$0xff]  ;;  %s718_s3 = smov [#allocation10]  }
  0x3d   :  { %581 = vmatmul.mubr.msk.f32.vlgmr.msra.gmra.mxu0 %vm93_vm0, %v81_v5  ;;  %394 = vmatprep.subr.mxu0 %v252_v35  ;;  %v559_v60 = vld [vmem:[%s805_s4] ss:$0 sm:$0xff]  ;;  %v247_v3 = vld [vmem:[#allocation7 + $0x80] sm:$0xff]  ;;  %v242_v5 = vld [vmem:[#allocation7 + $0x58] sm:$0xff]  ;;  %s541_s4 = sshll.u32 %s718_s3, 4  ;;  %s542_s4 = int_to_ptr.vmem [resolvable:$true] %s541_s4 }
  0x3e   :  { %395 = vmatpush1.msra.mxu0 %v251_v37  ;;  %322 = vmatpush1.msra.mxu1 %v237_v42  ;;  %v253_v0 = vld [vmem:[#allocation7 + $0xb0] sm:$0xff]  ;;  %s681_s26 = scalar_lea.vmem %s542_s4, 1536  ;;  %p686_p7 = scmp.lt.s32.totalorder %s542_s4, %s542_s4 }
  0x3f   :  { %396 = vmatprep.subr.mxu0 %v246_v39  ;;  %323 = vmatprep.subr.mxu1 %v232_v44  ;;  %p682_p6 = scmp.ne.s32.totalorder %s542_s4, %s681_s26  ;;  %p687_p8 = scmp.lt.s32.totalorder %s681_s26, %s681_s26 }
  0x40   :  { %397 = vmatpush1.msra.mxu0 %v245_v41  ;;  %324 = vmatpush1.msra.mxu1 %v231_v47 }
  0x41   :  { %398 = vmatprep.subr.mxu0 %v240_v43  ;;  %434 = vmatprep.mubr.f32.mxu0 %v717_v50  ;;  %p688_p9 = por %p687_p8, %p686_p7 }
  0x42   :  { %399 = vmatpush1.msra.mxu0 %v239_v45  ;;  %471 = vmatprep.subr.mxu1 %v254_v49 }
  0x43   :  { %400 = vmatprep.subr.mxu0 %v234_v46  ;;  %p689_p10 = pnand %p688_p9, %p682_p6 }
  0x44   :  { %401 = vmatpush1.msra.mxu0 %v233_v48 }
  0xfd   :  { %v582_v7 = vpop.f32.mrf.mxu0 }
  0xfe   :  { %v172_v8 = vadd.f32 %v582_v7, %v555_v6  ;;  %v241_v7 = vld [vmem:[#allocation7 + $0x50] sm:$0xff] }
  0xff   :  { %v166_v9 = vpop.f32.mrf.mxu0 }
 0x100   :  { %v179_v10 = vmul.f32 0.70710677, %v172_v8  ;;  %v167_v11 = vadd.f32 %v555_v6, %v166_v9  ;;  %v176_v18 = vmul.f32 0.5, %v172_v8  ;;  %v236_v8 = vld [vmem:[#allocation7 + $0x28] sm:$0xff]  ;;  %v235_v9 = vld [vmem:[#allocation7 + $0x20] sm:$0xff] }
 0x102   :  { %593 = verf.f32 %v179_v10  ;;  %v178_v12 = vmul.f32 0.70710677, %v167_v11  ;;  %v175_v15 = vmul.f32 0.5, %v167_v11  ;;  %v257_v10 = vlaneseq }
 0x104   :  { %595 = verf.f32 %v178_v12  ;;  %v258_v11 = vshrl.u32 %v257_v10, 7 }
 0x106   :  { %v259_v12 = vsub.s32 0, %v258_v11 }
 0x10f   :  { %v594_v13 = vpop.eup %593 }
 0x110   :  { %v183_v17 = vadd.f32 1.0, %v594_v13  ;;  %v267_v13 = vsub.s32 2, %v258_v11 }
 0x111   :  { %v596_v14 = vpop.eup %595 }
 0x112   :  { %v182_v16 = vadd.f32 1.0, %v596_v14  ;;  %v185_v21 = vmul.f32 %v183_v17, %v176_v18  ;;  %v255_v14 = vld [vmem:[#allocation8] sm:$0x3f] }
 0x113   :  { %v260_v17 = vrot.slane %v255_v14, %v259_v12  ;;  %v268_v18 = vrot.slane %v255_v14, %v267_v13 }
 0x114   :  { %v184_v19 = vmul.f32 %v182_v16, %v175_v15  ;;  %v189_v22 = vsel %vm93_vm0, %v185_v21, 0.0  ;;  %v263_v15 = vsub.s32 1, %v258_v11  ;;  %v271_v16 = vsub.s32 3, %v258_v11 }
 0x116   :  { %v186_v20 = vsel %vm93_vm0, %v184_v19, 0.0 }
 0x117   :  { %187 = vadd.xlane.f32.xlu0 %v186_v20  ;;  %v272_v20 = vrot.slane %v255_v14, %v271_v16 }
 0x11b   :  { %190 = vadd.xlane.f32.xlu0 %v189_v22 }
 0x1a0   :  { %v188_v23 = vpop.xlane.xlu0 %187 }
 0x1a1   :  { %v193_v24 = vmul.f32 0.03125, %v188_v23 }
 0x1a3   :  { %v195_v25 = vsub.f32 %v184_v19, %v193_v24  ;;  %v264_v19 = vrot.slane %v255_v14, %v263_v15 }
 0x1a4   :  { %v191_v26 = vpop.xlane.xlu0 %190 }
 0x1a5   :  { %v194_v27 = vmul.f32 0.03125, %v191_v26  ;;  %v197_v28 = vmul.f32 %v195_v25, %v195_v25 }
 0x1a7   :  { %v196_v29 = vsub.f32 %v185_v21, %v194_v27  ;;  %v199_v30 = vsel %vm93_vm0, %v197_v28, 0.0 }
 0x1a8   :  { %200 = vadd.xlane.f32.xlu1 %v199_v30  ;;  %v279_v30 = vsub.s32 5, %v258_v11 }
 0x1a9   :  { %v198_v31 = vmul.f32 %v196_v29, %v196_v29 }
 0x1aa   :  { %v280_v39 = vrot.slane %v255_v14, %v279_v30 }
 0x1ab   :  { %v202_v32 = vsel %vm93_vm0, %v198_v31, 0.0 }
 0x1ac   :  { %203 = vadd.xlane.f32.xlu1 %v202_v32 }
 0x231   :  { %v201_v51 = vpop.xlane.xlu1 %200 }
 0x232   :  { %v205_v52 = vmul.f32 0.03125, %v201_v51 }
 0x234   :  { %v207_v53 = vadd.f32 1e-12, %v205_v52 }
 0x235   :  { %v204_v54 = vpop.xlane.xlu1 %203 }
 0x236   :  { %597 = vrsqrt.f32 %v207_v53  ;;  %v206_v55 = vmul.f32 0.03125, %v204_v54 }
 0x238   :  { %v208_v56 = vadd.f32 1e-12, %v206_v55 }
 0x23a   :  { %599 = vrsqrt.f32 %v208_v56 }
 0x243   :  { %v598_v57 = vpop.eup %597 }
 0x244   :  { %v211_v59 = vmul.f32 %v598_v57, %v195_v25  ;;  %v275_v25 = vsub.s32 4, %v258_v11 }
 0x246   :  { %v220_v61 = vmul.f32 %v558_v58, %v211_v59  ;;  %v276_v34 = vrot.slane %v255_v14, %v275_v25 }
 0x247   :  { %v600_v62 = vpop.eup %599 }
 0x248   :  { %v229_v63 = vadd.f32 %v559_v60, %v220_v61  ;;  %v212_v1 = vmul.f32 %v600_v62, %v196_v29 }
 0x24a   :  { %560 = vmatmul.mubr.msk.f32.vlgmr.msra.gmra.mxu1 %vm93_vm0, %v229_v63  ;;  %562 = vmatmul.mubr.msk.f32.vlgmr.msra.gmra.mxu0 %vm93_vm0, %v229_v63  ;;  %v221_v4 = vmul.f32 %v558_v58, %v212_v1 }
 0x24b   :  { %472 = vmatpush1.msra.mxu1 %v253_v0  ;;  %363 = vmatprep.mubr.f32.mxu1 %v717_v50 }
 0x24c   :  { %473 = vmatprep.subr.mxu1 %v248_v2  ;;  %440 = vmatprep.mubr.f32.mxu0 %v717_v50  ;;  %v230_v6 = vadd.f32 %v559_v60, %v221_v4 }
 0x24d   :  { %474 = vmatpush1.msra.mxu1 %v247_v3 }
 0x24e   :  { %475 = vmatprep.subr.mxu1 %v242_v5  ;;  %561 = vmatmul.mubr.msk.f32.gmra.mxu1 %vm93_vm0, %v230_v6 }
 0x24f   :  { %563 = vmatmul.mubr.msk.f32.gmra.mxu0 %vm93_vm0, %v230_v6  ;;  %476 = vmatpush1.msra.mxu1 %v241_v7 }
 0x250   :  { %477 = vmatprep.subr.mxu1 %v236_v8  ;;  %511 = vmatprep.mubr.f32.mxu1 %v717_v50 }
 0x251   :  { %478 = vmatpush1.msra.mxu1 %v235_v9 }
 0x252   :  { %564 = vmatmul.mubr.msk.f32.vlgmr.msra.gmra.mxu1 %vm93_vm0, %v229_v63 }
 0x253   :  { %517 = vmatprep.mubr.f32.mxu1 %v717_v50 }
 0x256   :  { %565 = vmatmul.mubr.msk.f32.gmra.mxu1 %vm93_vm0, %v230_v6 }
 0x30a   :  { %v359_v21 = vpop.f32.mrf.mxu1  ;;  %v436_v22 = vpop.f32.mrf.mxu0 }
 0x30b   :  { %v360_v23 = vadd.f32 %v359_v21, %v260_v17  ;;  %v437_v24 = vadd.f32 %v436_v22, %v268_v18 }
 0x30c   :  { %v361_v26 = vpop.f32.mrf.mxu1  ;;  %v438_v27 = vpop.f32.mrf.mxu0 }
 0x30d   :  { %524 = vst [vmem:[#allocation10] sm:$0xff] %v360_v23  ;;  %526 = vst [vmem:[#allocation10 + $0x10] sm:$0xff] %v437_v24  ;;  %v362_v28 = vadd.f32 %v361_v26, %v264_v19  ;;  %v439_v29 = vadd.f32 %v438_v27, %v272_v20 }
 0x30e   :  { %v365_v31 = vpop.f32.mrf.mxu1 }
 0x30f   :  { %525 = vst [vmem:[#allocation10 + $0x8] sm:$0xff] %v362_v28  ;;  %527 = vst [vmem:[#allocation10 + $0x18] sm:$0xff] %v439_v29  ;;  %v366_v32 = vadd.f32 %v365_v31, %v260_v17  ;;  %v442_v33 = vpop.f32.mrf.mxu0 }
 0x310   :  { %v443_v35 = vadd.f32 %v442_v33, %v268_v18  ;;  %v367_v36 = vpop.f32.mrf.mxu1 }
 0x311   :  { %530 = vst [vmem:[#allocation10 + $0x30] sm:$0xff] %v366_v32  ;;  %v368_v37 = vadd.f32 %v367_v36, %v264_v19  ;;  %v444_v38 = vpop.f32.mrf.mxu0 }
 0x312   :  { %532 = vst [vmem:[#allocation10 + $0x40] sm:$0xff] %v443_v35  ;;  %v445_v40 = vadd.f32 %v444_v38, %v272_v20  ;;  %v513_v41 = vpop.f32.mrf.mxu1 }
 0x313   :  { %531 = vst [vmem:[#allocation10 + $0x38] sm:$0xff] %v368_v37  ;;  %v514_v42 = vadd.f32 %v513_v41, %v276_v34 }
 0x314   :  { %533 = vst [vmem:[#allocation10 + $0x48] sm:$0xff] %v445_v40  ;;  %v515_v43 = vpop.f32.mrf.mxu1 }
 0x315   :  { %528 = vst [vmem:[#allocation10 + $0x20] sm:$0xff] %v514_v42  ;;  %v516_v44 = vadd.f32 %v515_v43, %v280_v39 }
 0x316   :  { %v519_v45 = vpop.f32.mrf.mxu1 }
 0x317   :  { %529 = vst [vmem:[#allocation10 + $0x28] sm:$0xff] %v516_v44  ;;  %v520_v46 = vadd.f32 %v519_v45, %v276_v34 }
 0x318   :  { %v521_v47 = vpop.f32.mrf.mxu1 }
 0x319   :  { %534 = vst [vmem:[#allocation10 + $0x50] sm:$0xff] %v520_v46  ;;  %v522_v48 = vadd.f32 %v521_v47, %v280_v39 }
 0x31b   :  { %535 = vst [vmem:[#allocation10 + $0x58] sm:$0xff] %v522_v48 }
 0x31c   :  { %692 = shalt.err (!%p689_p10)
}
 0x31d   :  { %547 = dma.vmem_to_hbm [thread:$0]  %s542_s4, 1536, %s808_s7, [#allocation4], %s714_s1, %s714_s1, %s715_s16  }
 0x31e   :  { %707 = dma.done.wait [#allocation4], 1536  }
 0x31f   :  { %708 = vsyncadd [#allocation4], 4294965760 }
 0x320   :  { %551 = vsyncpa [#allocation3], 1 }
 0x321   :  { %552 = vsyncpa [#allocation6], 1 }
 0x322   :  { %553 = vsyncpa [#allocation9], 1 }
 0x323   :  { %554 = vsyncpa [#allocation4], 1 }

</bundles_post_ra>
